<compile_context>
chip_gen: v5e
topology: v5e:2x2
jax: 0.10.0
libtpu: 0.0.40
codegen_flags: <defaults>
</compile_context>

<pallas_src>
import math

import jax
import jax.numpy as jnp
from jax.experimental import pallas as pl
from jax.experimental.pallas import tpu as pltpu

_GELU_C = math.sqrt(2.0 / math.pi)
_MiB = 1024 * 1024


def _round_up(x, m):
    return (x + m - 1) // m * m


def _cdiv(a, b):
    return (a + b - 1) // b


def _chip_generation():
    """Best-effort TPU generation (4/5/6/7); 0 if unknown."""
    try:
        kind = jax.devices()[0].device_kind.lower()
    except Exception:
        return 0
    for g in (7, 6, 5, 4):
        if "v%d" % g in kind:
            return g
    return 0


def _vmem_capacity_bytes(gen):
    try:
        cap = getattr(pltpu.get_tpu_info(), "vmem_capacity_bytes", None)
        if cap:
            return int(cap)
    except Exception:
        pass
    if gen >= 7:
        return 64 * _MiB      # v7x: 64 MiB per TensorCore
    if gen in (5, 6):
        return 128 * _MiB     # v5e / v6e
    return 64 * _MiB          # unknown: conservative


def _make_ffn_kernel(gelu_dtype):
    def kernel(x_ref, w1_ref, b1_ref, w2_ref, b2_ref, o_ref, acc_ref):
        # x_ref:  (tm, emb) bf16 | w1_ref: (emb, th) bf16 | b1_ref: (1, th) f32
        # w2_ref: (th, emb) bf16 | b2_ref: (1, emb) f32
        # o_ref:  (tm, emb) out dtype | acc_ref: (tm, emb) f32, carried over j
        j = pl.program_id(1)

        @pl.when(j == 0)
        def _():
            acc_ref[...] = jnp.zeros_like(acc_ref)

        # First matmul (bf16 operands -> f32 accumulate) + bias chunk in f32.
        h = jnp.dot(x_ref[...], w1_ref[...], preferred_element_type=jnp.float32)
        h = (h + b1_ref[...]).astype(gelu_dtype)

        # tanh-GELU (matches the PyTorch approximation), factored to save a
        # vmul; runs in bf16 on v6e/v7x, f32 on v5e.
        inner = (_GELU_C * h) * (1.0 + 0.044715 * (h * h))
        g = (0.5 * h) * (1.0 + jnp.tanh(inner))

        # Second matmul: this hid chunk's partial contribution.
        acc_ref[...] += jnp.dot(g.astype(w2_ref.dtype), w2_ref[...],
                                preferred_element_type=jnp.float32)

        @pl.when(j == pl.num_programs(1) - 1)
        def _():
            o_ref[...] = (acc_ref[...] + b2_ref[...]).astype(o_ref.dtype)

    return kernel


def _vmem_footprint(tm, th, emb, out_itemsize, gelu_itemsize):
    """Per-step VMEM estimate incl. double-buffering and GELU intermediates."""
    return (2 * tm * emb * 2                    # x tile (bf16, 2 bufs)
            + 2 * emb * th * 2                  # W1 tile (bf16, 2 bufs)
            + 2 * th * emb * 2                  # W2 tile (bf16, 2 bufs)
            + 2 * th * 4 + 2 * emb * 4          # bias tiles (f32, 2 bufs)
            + 2 * tm * emb * out_itemsize       # output tile (2 bufs)
            + tm * emb * 4                      # f32 accumulator scratch
            + tm * th * 4                       # h in f32 (dot result + bias)
            + 3 * tm * th * gelu_itemsize)      # GELU temporaries / g


def _choose_tm(M, is_v7x, tm_req):
    m16 = _round_up(max(M, 1), 16)
    tm_cap = m16
    if is_v7x and M >= 256:
        # Keep >= 2 row blocks so the "parallel" axis shards across both TCs.
        tm_cap = min(tm_cap, _round_up(_cdiv(M, 2), 16))
    if tm_req is not None:
        return max(16, min(_round_up(tm_req, 16), tm_cap))
    tm_target = min(1024 if M >= 4096 else 512, tm_cap)
    if m16 <= tm_target:
        return max(16, m16)
    # Candidates: tm_target plus multiples of 128 below it.  Minimize number of
    # row tiles (weight-stream HBM traffic), then padded rows, then prefer the
    # larger tile.
    cands = {tm_target}
    c = (tm_target // 128) * 128
    while c >= 128:
        cands.add(c)
        c -= 128
    best_tm, best_cost = None, None
    for c in sorted(cands, reverse=True):
        m_pad = _round_up(M, c)
        cost = (m_pad // c, m_pad, -c)
        if best_cost is None or cost < best_cost:
            best_cost, best_tm = cost, c
    return best_tm


def feed_forward(x, w1, b1, w2, b2, *, tm=None, th=None):
    """Fused Linear -> GELU(tanh) -> Linear.

    x:  (..., emb)
    w1: (emb, hid), b1: (hid,)     (hid = 4*emb in the reference module)
    w2: (hid, emb), b2: (emb,)
    Returns an array with the same shape/dtype as x.
    """
    orig_shape = x.shape
    orig_dtype = x.dtype
    emb = orig_shape[-1]
    hid = w1.shape[1]
    assert w1.shape == (emb, hid) and w2.shape == (hid, emb)
    b1 = jnp.asarray(b1).reshape(-1)
    b2 = jnp.asarray(b2).reshape(-1)
    assert b1.shape[0] == hid and b2.shape[0] == emb

    gen = _chip_generation()
    is_v7x = gen >= 7
    vmem_cap = _vmem_capacity_bytes(gen)
    vmem_budget = (vmem_cap * 13) // 16          # ~52 MiB of 64 / ~104 of 128
    # bf16 GELU where the chip has bf16 VALU/EUP; f32 on v5e / unknown.
    gelu_dtype = jnp.bfloat16 if gen >= 6 else jnp.float32
    gelu_itemsize = jnp.dtype(gelu_dtype).itemsize
    out_itemsize = jnp.dtype(orig_dtype).itemsize

    x2d = x.reshape(-1, emb)
    M = x2d.shape[0]

    tm_sel = _choose_tm(M, is_v7x, tm)

    # Hidden-dim tile: multiple of 128, generation-aware target.
    hid128 = _round_up(hid, 128)
    th_target = th if th is not None else (2048 if vmem_cap >= 100 * _MiB else 1024)
    th_sel = max(128, min(_round_up(th_target, 128), hid128))
    th_sel = (th_sel // 128) * 128

    # Shrink th, then tm, until the footprint fits the VMEM budget.
    while (th_sel > 128 and
           _vmem_footprint(tm_sel, th_sel, emb, out_itemsize, gelu_itemsize) > vmem_budget):
        th_sel -= 128
    while (tm_sel > 128 and
           _vmem_footprint(tm_sel, th_sel, emb, out_itemsize, gelu_itemsize) > vmem_budget):
        tm_sel = max(128, _round_up(tm_sel // 2, 16))
    m_pad = _round_up(M, tm_sel)

    # Align th with hid: largest multiple of 128 <= th_sel dividing hid, else
    # zero-pad the hidden dimension (exact: padded W1 cols / b1 / W2 rows = 0).
    t = th_sel
    while t >= 128 and hid % t != 0:
        t -= 128
    if t >= 128:
        th_sel = t
        hid_pad = hid
    else:
        hid_pad = _round_up(hid, th_sel)

    if m_pad != M:
        x2d = jnp.pad(x2d, ((0, m_pad - M), (0, 0)))
    if hid_pad != hid:
        w1 = jnp.pad(w1, ((0, 0), (0, hid_pad - hid)))
        b1 = jnp.pad(b1, ((0, hid_pad - hid),))
        w2 = jnp.pad(w2, ((0, hid_pad - hid), (0, 0)))

    # bf16 operands for the MXU; biases / accumulation stay in f32.
    x_bf = x2d.astype(jnp.bfloat16)
    w1_bf = w1.astype(jnp.bfloat16)
    w2_bf = w2.astype(jnp.bfloat16)
    b1_2d = b1.reshape(1, hid_pad).astype(jnp.float32)
    b2_2d = b2.reshape(1, emb).astype(jnp.float32)

    grid = (m_pad // tm_sel, hid_pad // th_sel)
    n_row_tiles = grid[0]

    weight_bytes = (w1_bf.size * 2 + w2_bf.size * 2 + b1_2d.size * 4 + b2_2d.size * 4)
    cost = pl.CostEstimate(
        flops=4 * m_pad * emb * hid_pad,          # two matmuls, 2 flops / MAC
        transcendentals=m_pad * hid_pad,          # one tanh per hidden activation
        bytes_accessed=(x_bf.size * 2
                        + n_row_tiles * weight_bytes   # weights re-streamed per row tile
                        + m_pad * emb * out_itemsize),
    )

    footprint = _vmem_footprint(tm_sel, th_sel, emb, out_itemsize, gelu_itemsize)
    vmem_limit = int(min(max(footprint * 5 // 4, 32 * _MiB),
                         max(vmem_budget, footprint)))

    kernel = _make_ffn_kernel(gelu_dtype)
    out = pl.pallas_call(
        kernel,
        out_shape=jax.ShapeDtypeStruct((m_pad, emb), orig_dtype),
        grid_spec=pltpu.PrefetchScalarGridSpec(
            num_scalar_prefetch=0,
            grid=grid,
            in_specs=[
                pl.BlockSpec((tm_sel, emb), lambda i, j: (i, 0)),   # x rows (constant over j)
                pl.BlockSpec((emb, th_sel), lambda i, j: (0, j)),   # W1 hid chunk (streams)
                pl.BlockSpec((1, th_sel), lambda i, j: (0, j)),     # b1 hid chunk
                pl.BlockSpec((th_sel, emb), lambda i, j: (j, 0)),   # W2 hid chunk (streams)
                pl.BlockSpec((1, emb), lambda i, j: (0, 0)),        # b2 (constant)
            ],
            out_specs=pl.BlockSpec((tm_sel, emb), lambda i, j: (i, 0)),
            scratch_shapes=[pltpu.VMEM((tm_sel, emb), jnp.float32)],
        ),
        compiler_params=pltpu.CompilerParams(
            dimension_semantics=("parallel", "arbitrary"),
            vmem_limit_bytes=vmem_limit,
        ),
        cost_estimate=cost,
    )(x_bf, w1_bf, b1_2d, w2_bf, b2_2d)

    return out[:M].reshape(orig_shape)


def _reference(x, w1, b1, w2, b2):
    # Pure f32 reference matching the PyTorch module (Linear -> GELU(tanh) -> Linear).
    h = x @ w1 + b1
    g = 0.5 * h * (1.0 + jnp.tanh(_GELU_C * (h + 0.044715 * h ** 3)))
    return g @ w2 + b2


if __name__ == "__main__":
    # Config: emb_dim=128 (lane-dense output), hidden = 4*emb = 512.
    emb_dim = 128
    hid_dim = 4 * emb_dim
    batch, seq = 2, 8

    key = jax.random.PRNGKey(0)
    kx, k1, k2, k3, k4 = jax.random.split(key, 5)

    x = jax.random.normal(kx, (batch, seq, emb_dim), dtype=jnp.float32)
    # Deterministic synthetic parameters (not a checkpoint load).
    w1 = jax.random.normal(k1, (emb_dim, hid_dim), dtype=jnp.float32) * 0.02
    b1 = jax.random.normal(k2, (hid_dim,), dtype=jnp.float32) * 0.02
    w2 = jax.random.normal(k3, (hid_dim, emb_dim), dtype=jnp.float32) * 0.02
    b2 = jax.random.normal(k4, (emb_dim,), dtype=jnp.float32) * 0.02

    # th=256 so the demo exercises the hid-reduction grid axis (2 steps).
    out = feed_forward(x, w1, b1, w2, b2, th=256)
    out = jax.block_until_ready(out)

    ref = _reference(x, w1, b1, w2, b2)
    assert out.shape == x.shape and out.dtype == x.dtype
    # bf16 matmul operands -> tolerance loosened vs the pure-f32 reference.
    assert jnp.allclose(out, ref, atol=1e-2, rtol=1e-2), (
        float(jnp.max(jnp.abs(out - ref))))

    print("KERNEL_OK")
</pallas_src>

<mosaic_0001>
module attributes {stable_mosaic.version = 11 : i64} {
  func.func @kernel(%arg0: i32, %arg1: i32, %arg2: memref<16x128xbf16, #tpu.memory_space<vmem>>, %arg3: memref<128x256xbf16, #tpu.memory_space<vmem>>, %arg4: memref<1x256xf32, #tpu.memory_space<vmem>>, %arg5: memref<256x128xbf16, #tpu.memory_space<vmem>>, %arg6: memref<1x128xf32, #tpu.memory_space<vmem>>, %arg7: memref<16x128xf32, #tpu.memory_space<vmem>>, %arg8: memref<16x128xf32, #tpu.memory_space<vmem>>) attributes {dimension_semantics = [#tpu.dimension_semantics<parallel>, #tpu.dimension_semantics<arbitrary>], iteration_bounds = array<i64: 1, 2>, scalar_prefetch = 0 : i64, scratch_operands = 1 : i64, tpu.core_type = #tpu.core_type<tc>, window_params = [{transform_indices = @transform_0, window_bounds = array<i64: 16, 128>}, {transform_indices = @transform_1, window_bounds = array<i64: 128, 256>}, {transform_indices = @transform_2, window_bounds = array<i64: 1, 256>}, {transform_indices = @transform_3, window_bounds = array<i64: 256, 128>}, {pipeline_mode = #tpu.pipeline_mode<synchronous>, transform_indices = @transform_4, window_bounds = array<i64: 1, 128>}, {transform_indices = @transform_5, window_bounds = array<i64: 16, 128>}]} {
    %c0_i32 = arith.constant 0 : i32
    %0 = arith.cmpi eq, %arg1, %c0_i32 : i32
    %1 = arith.extui %0 : i1 to i32
    %c0_i32_0 = arith.constant 0 : i32
    %2 = arith.cmpi ne, %1, %c0_i32_0 : i32
    scf.if %2 {
      %cst_19 = arith.constant 0.000000e+00 : f32
      %32 = vector.broadcast %cst_19 : f32 to vector<16x128xf32>
      %c0_20 = arith.constant 0 : index
      %c0_21 = arith.constant 0 : index
      %33 = vector.load %arg8[%c0_20, %c0_21] : memref<16x128xf32, #tpu.memory_space<vmem>>, vector<16x128xf32>
      tpu.vector_store %arg8[%c0_20, %c0_21], %32 {strides = array<i32>} : memref<16x128xf32, #tpu.memory_space<vmem>>, vector<16x128xf32>,
    } else {
    }
    %c0 = arith.constant 0 : index
    %c0_1 = arith.constant 0 : index
    %3 = vector.load %arg2[%c0, %c0_1] : memref<16x128xbf16, #tpu.memory_space<vmem>>, vector<16x128xbf16>
    %c0_2 = arith.constant 0 : index
    %c0_3 = arith.constant 0 : index
    %4 = vector.load %arg3[%c0_2, %c0_3] : memref<128x256xbf16, #tpu.memory_space<vmem>>, vector<128x256xbf16>
    %cst = arith.constant dense<0.000000e+00> : vector<16x256xf32>
    %5 = tpu.matmul %3, %4, %cst {dimension_numbers = #tpu.dot_dimension_numbers<[1], [0], [0], [1], [0, 0, 1, 1], [], []>} : vector<16x128xbf16>, vector<128x256xbf16>, vector<16x256xf32> -> vector<16x256xf32>
    %c0_4 = arith.constant 0 : index
    %c0_5 = arith.constant 0 : index
    %6 = vector.load %arg4[%c0_4, %c0_5] : memref<1x256xf32, #tpu.memory_space<vmem>>, vector<1x256xf32>
    %7 = vector.broadcast %6 : vector<1x256xf32> to vector<16x256xf32>
    %8 = arith.addf %5, %7 : vector<16x256xf32>
    %cst_6 = arith.constant 0.797884583 : f32
    %9 = vector.broadcast %cst_6 : f32 to vector<16x256xf32>
    %10 = arith.mulf %9, %8 : vector<16x256xf32>
    %11 = arith.mulf %8, %8 : vector<16x256xf32>
    %cst_7 = arith.constant 4.471500e-02 : f32
    %12 = vector.broadcast %cst_7 : f32 to vector<16x256xf32>
    %13 = arith.mulf %12, %11 : vector<16x256xf32>
    %cst_8 = arith.constant 1.000000e+00 : f32
    %14 = vector.broadcast %cst_8 : f32 to vector<16x256xf32>
    %15 = arith.addf %14, %13 : vector<16x256xf32>
    %16 = arith.mulf %10, %15 : vector<16x256xf32>
    %cst_9 = arith.constant 5.000000e-01 : f32
    %17 = vector.broadcast %cst_9 : f32 to vector<16x256xf32>
    %18 = arith.mulf %17, %8 : vector<16x256xf32>
    %19 = math.tanh %16 : vector<16x256xf32>
    %cst_10 = arith.constant 1.000000e+00 : f32
    %20 = vector.broadcast %cst_10 : f32 to vector<16x256xf32>
    %21 = arith.addf %20, %19 : vector<16x256xf32>
    %22 = arith.mulf %18, %21 : vector<16x256xf32>
    %c0_11 = arith.constant 0 : index
    %c0_12 = arith.constant 0 : index
    %23 = vector.load %arg8[%c0_11, %c0_12] : memref<16x128xf32, #tpu.memory_space<vmem>>, vector<16x128xf32>
    %24 = arith.truncf %22 : vector<16x256xf32> to vector<16x256xbf16>
    %c0_13 = arith.constant 0 : index
    %c0_14 = arith.constant 0 : index
    %25 = vector.load %arg5[%c0_13, %c0_14] : memref<256x128xbf16, #tpu.memory_space<vmem>>, vector<256x128xbf16>
    %cst_15 = arith.constant dense<0.000000e+00> : vector<16x128xf32>
    %26 = tpu.matmul %24, %25, %cst_15 {dimension_numbers = #tpu.dot_dimension_numbers<[1], [0], [0], [1], [0, 0, 1, 1], [], []>} : vector<16x256xbf16>, vector<256x128xbf16>, vector<16x128xf32> -> vector<16x128xf32>
    %27 = arith.addf %23, %26 : vector<16x128xf32>
    %c0_16 = arith.constant 0 : index
    %c0_17 = arith.constant 0 : index
    %28 = vector.load %arg8[%c0_16, %c0_17] : memref<16x128xf32, #tpu.memory_space<vmem>>, vector<16x128xf32>
    tpu.vector_store %arg8[%c0_16, %c0_17], %27 {strides = array<i32>} : memref<16x128xf32, #tpu.memory_space<vmem>>, vector<16x128xf32>,
    %c1_i32 = arith.constant 1 : i32
    %29 = arith.cmpi eq, %arg1, %c1_i32 : i32
    %30 = arith.extui %29 : i1 to i32
    %c0_i32_18 = arith.constant 0 : i32
    %31 = arith.cmpi ne, %30, %c0_i32_18 : i32
    scf.if %31 {
      %c0_19 = arith.constant 0 : index
      %c0_20 = arith.constant 0 : index
      %32 = vector.load %arg8[%c0_19, %c0_20] : memref<16x128xf32, #tpu.memory_space<vmem>>, vector<16x128xf32>
      %c0_21 = arith.constant 0 : index
      %c0_22 = arith.constant 0 : index
      %33 = vector.load %arg6[%c0_21, %c0_22] : memref<1x128xf32, #tpu.memory_space<vmem>>, vector<1x128xf32>
      %34 = vector.broadcast %33 : vector<1x128xf32> to vector<16x128xf32>
      %35 = arith.addf %32, %34 : vector<16x128xf32>
      %c0_23 = arith.constant 0 : index
      %c0_24 = arith.constant 0 : index
      %36 = vector.load %arg7[%c0_23, %c0_24] : memref<16x128xf32, #tpu.memory_space<vmem>>, vector<16x128xf32>
      tpu.vector_store %arg7[%c0_23, %c0_24], %35 {strides = array<i32>} : memref<16x128xf32, #tpu.memory_space<vmem>>, vector<16x128xf32>,
    } else {
    }
    return
  }
  func.func @transform_0(%arg0: i32, %arg1: i32) -> (i32, i32) {
    %c0_i32 = arith.constant 0 : i32
    %c0_i32_0 = arith.constant 0 : i32
    return %arg0, %c0_i32 : i32, i32
  }
  func.func @transform_1(%arg0: i32, %arg1: i32) -> (i32, i32) {
    %c0_i32 = arith.constant 0 : i32
    %c0_i32_0 = arith.constant 0 : i32
    return %c0_i32, %arg1 : i32, i32
  }
  func.func @transform_2(%arg0: i32, %arg1: i32) -> (i32, i32) {
    %c0_i32 = arith.constant 0 : i32
    %c0_i32_0 = arith.constant 0 : i32
    return %c0_i32, %arg1 : i32, i32
  }
  func.func @transform_3(%arg0: i32, %arg1: i32) -> (i32, i32) {
    %c0_i32 = arith.constant 0 : i32
    %c0_i32_0 = arith.constant 0 : i32
    return %arg1, %c0_i32 : i32, i32
  }
  func.func @transform_4(%arg0: i32, %arg1: i32) -> (i32, i32) {
    %c0_i32 = arith.constant 0 : i32
    %c0_i32_0 = arith.constant 0 : i32
    %c0_i32_1 = arith.constant 0 : i32
    return %c0_i32, %c0_i32_0 : i32, i32
  }
  func.func @transform_5(%arg0: i32, %arg1: i32) -> (i32, i32) {
    %c0_i32 = arith.constant 0 : i32
    %c0_i32_0 = arith.constant 0 : i32
    return %arg0, %c0_i32 : i32, i32
  }
}

</mosaic_0001>

<bundles_post_ra>
// kernel: tpu_custom_call.1
= control target key start
LH: loop header
LB: loop body
LE: loop exit
PB: predicated region body
PF: predicated region fallthrough
CT: control target
= control target key end

     0   :  { %s1601_s0 = inlined_call_operand.hbm [shape: bf16[16,128], index: 0, kind: input, shape index: {}]   ;;  %s1602_s1 = inlined_call_operand.hbm [shape: bf16[128,512], index: 1, kind: input, shape index: {}]   ;;  %s1603_s2 = inlined_call_operand.hbm [shape: f32[1,512], index: 2, kind: input, shape index: {}]   ;;  %s1604_s3 = inlined_call_operand.hbm [shape: bf16[512,128], index: 3, kind: input, shape index: {}]   ;;  %s1605_s4 = inlined_call_operand.vmem [shape: f32[1,128], index: 4, kind: input, shape index: {}]   ;;  %s1606_s5 = inlined_call_operand.hbm [shape: f32[16,128], index: 5, kind: output, shape index: {}]  }
   0x1   :  { %1611 = sst [smem:[#allocation20_spill]] %s1601_s0 }
   0x2   :  { %1612 = sst [smem:[#allocation21_spill]] %s1602_s1 }
   0x3   :  { %10 = vsyncpa [#allocation4], 0 }
   0x4   :  { %11 = vsyncpa [#allocation7], 0 }
   0x5   :  { %13 = vsyncpa [#allocation7 + $0x1], 0 }
   0x6   :  { %14 = vsyncpa [#allocation10], 0 }
   0x7   :  { %16 = vsyncpa [#allocation10 + $0x1], 0 }
   0x8   :  { %17 = vsyncpa [#allocation5], 0  ;;  %s1390_s18 = smov 0   ;;  %s1392_s19 = smov 0  }
   0x9   :  { %s1394_s20 = smov 0   ;;  %s1396_s21 = smov 0  }
   0xa   :  { %s1398_s22 = smov 0   ;;  %s1400_s23 = smov 0  }
   0xb LB: > { %1613 = sst [smem:[#allocation16_spill]] %s1336_s20  ;;  %s32_s24 = sadd.s32 1, %s1344_s22  ;;  %s1348_s23 = sphi %s1400_s23, %s23_s23   ;;  %s1344_s22 = sphi %s1398_s22, %s1631_s22   ;;  %s1340_s21 = sphi %s1396_s21, %s1630_s21   ;;  %s1336_s20 = sphi %s1394_s20, %s1626_s20   ;;  %s1332_s19 = sphi %s1392_s19, %s1629_s19   ;;  %s1328_s18 = sphi %s1390_s18, %s1628_s18  }
   0xc   : > { %1614 = sst [smem:[#allocation17_spill]] %s1348_s23  ;;  %s68_s25 = sadd.s32 1, %s1336_s20 }
   0xd   : > { %p33_p0 = scmp.ge.s32.totalorder %s32_s24, 2  ;;  %p75_p1 = scmp.ne.s32.totalorder %s1336_s20, %s1332_s19 }
   0xe   : > { %p76_p2 = scmp.eq.s32.totalorder %s1348_s23, 0  ;;  %p1067_p4 = scmp.lt.s32.totalorder %s1348_s23, 2 }
   0xf   : > { %s1633_s24 = smov (%p33_p0, %s32_s24), 0  ;;  %s224_s28 = sand.u32 1, %s1348_s23  }
  0x10   : > { %1615 = sst [smem:[#allocation18_spill]] %s1633_s24  ;;  %p1427_p3 = por %p76_p2, %p75_p1 }
  0x11   : > { %s65_s27 = ssub.s32 %s1344_s22, %s1633_s24  ;;  %s1436_s29 = sand.u32 1, %s1336_s20  }
  0x12   : > { %p66_p5 = scmp.eq.s32.totalorder %s65_s27, 0  ;;  %s1003_s30 = sshll.u32 %s1344_s22, 3 }
  0x13   : > { %s1607_s7 = sshll.u32 %s1436_s29, 7  ;;  %s1618_s1 = sld [smem:[#allocation21_spill]] }
  0x14   : > { %s1440_s6 = scalar_select %p66_p5, %s1336_s20, %s68_s25  }
  0x15   : > { %s228_s12 = scalar_lea.vmem [#allocation6], %s1607_s7  ;;  %p1452_p6 = pnand %p1067_p4, %p1427_p3 }
  0x16   : > { %1617 = sst [smem:[#allocation19_spill]] %s1440_s6  ;;  %s236_s13 = sshll.u32 %s228_s12, 4  ;;  %s237_s13 = int_to_ptr.vmem [resolvable:$true] %s236_s13 }
  0x17   : > { %s1456_s15 = scalar_lea.sflag [#allocation7], %s224_s28  ;;  %s1350_s16 = smov 256  }
  0x18   : > { %s1351_s17 = smov 128   ;;  %s1352_s25 = smov 8  }
  0x19   : > { %s233_s10 = scalar_lea.hbm %s1618_s1, %s1003_s30  ;;  %s1462_s27 = sadd.s32 4294967295, %s1348_s23  }
  0x1a   : > { %s234_s11 = sshll.u32 %s233_s10, 4  ;;  %p81_p7 = scmp.ne.s32.totalorder %s1332_s19, %s1328_s18  ;;  %s235_s11 = int_to_ptr.hbm [resolvable:$true] %s234_s11 }
  0x1b   : > { %1059 = dma.hbm_to_vmem [thread:$0]  (!%p1452_p6), %s235_s11, 2048, %s237_s13, %s1456_s15, %s1350_s16, %s1351_s17, %s1352_s25  }
  0x1c   : > { %p82_p8 = scmp.eq.s32.totalorder %s1462_s27, 0  ;;  %p849_p9 = scmp.ge.s32.totalorder %s1348_s23, 1 }
  0x1d   : > { %p191_p10 = scmp.lt.s32.totalorder %s1348_s23, 3  ;;  %s1621_s0 = sld [smem:[#allocation20_spill]] }
  0x1e   : > { %p1471_p11 = por %p82_p8, %p81_p7  ;;  %s1353_s18 = smov [#allocation3]  }
  0x1f   : > { %p1478_p12 = pnand %p849_p9, %p191_p10  ;;  %s207_s10 = sshll.u32 %s1353_s18, 4  ;;  %s208_s10 = int_to_ptr.vmem [resolvable:$true] %s207_s10 }
  0x20   : > { %s855_s11 = sshll.u32 %s1436_s29, 1  ;;  %s856_s12 = sshll.u32 %s1344_s22, 1 }
  0x21   : > { %p1052_p13 = pneg %p1478_p12  ;;  %s254_s17 = scalar_lea.hbm %s1603_s2, %s856_s12 }
  0x22   : > { %s1354_s25 = smov 64   ;;  %s1355_s28 = smov 4  }
  0x23   : > { %s205_s8 = sshll.u32 %s1621_s0, 4  ;;  %p1053_p0 = pnand %p1052_p13, %p82_p8  ;;  %s206_s8 = int_to_ptr.hbm [resolvable:$true] %s205_s8 }
  0x24   : > { %s256_s30 = sshll.u32 %s254_s17, 4  ;;  %s250_s7 = scalar_lea.vmem [#allocation8], %s855_s11  ;;  %s257_s30 = int_to_ptr.hbm [resolvable:$true] %s256_s30 }
  0x25   : > { %1055 = dma.hbm_to_vmem [thread:$0]  (!%p1053_p0), %s206_s8, 128, %s208_s10, [#allocation4], %s1354_s25, %s1354_s25, %s1355_s28  }
  0x26   : > { %s258_s0 = sshll.u32 %s250_s7, 4  ;;  %s1004_s18 = sshll.u32 %s1344_s22, 7  ;;  %s259_s0 = int_to_ptr.vmem [resolvable:$true] %s258_s0 }
  0x27   : > { %1062 = dma.hbm_to_vmem [thread:$0]  (!%p1452_p6), %s257_s30, 32, %s259_s0, %s1456_s15  }
  0x28   : > { %s1623_s1 = sshll.u32 %s1436_s29, 7  ;;  %s274_s12 = scalar_lea.hbm %s1604_s3, %s1004_s18 }
  0x29   : > { %s269_s24 = scalar_lea.vmem [#allocation9], %s1623_s1  ;;  %s275_s13 = sshll.u32 %s274_s12, 4  ;;  %s276_s13 = int_to_ptr.hbm [resolvable:$true] %s275_s13 }
  0x2a   : > { %s277_s6 = sshll.u32 %s269_s24, 4  ;;  %s266_s16 = scalar_lea.sflag [#allocation10], %s1436_s29  ;;  %s278_s6 = int_to_ptr.vmem [resolvable:$true] %s277_s6 }
  0x2b   : > { %1065 = dma.hbm_to_vmem [thread:$0]  (!%p1452_p6), %s276_s13, 2048, %s278_s6, %s266_s16, %s1354_s25, %s1354_s25, %s1355_s28  }
  0x2c   : > { %289 = sbr.rel (%p1478_p12) target bundleno = 420 (0x1a4), region = 40 }
  0x31   : > { %1311 = dma.done.wait (%p82_p8), [#allocation4], 128  }
  0x32   : > { %1313 = vsyncadd (%p82_p8), [#allocation4], 4294967168  ;;  %s296_s0 = sand.u32 1, %s1462_s27   ;;  %s298_s1 = sand.u32 1, %s1332_s19  }
  0x33   : > { %s862_s20 = sshll.u32 %s298_s1, 7  ;;  %s297_s23 = scalar_lea.sflag [#allocation7], %s296_s0 }
  0x34   : > { %s1511_s24 = scalar_lea.vmem [#allocation6], %s862_s20 }
  0x35   : > { %1315 = dma.done.wait (%p1471_p11), %s297_s23, 2080  }
  0x36   : > { %1317 = vsyncadd (%p1471_p11), %s297_s23, 4294965216  ;;  %s863_s29 = sshll.u32 %s298_s1, 1  ;;  %s317_s7 = scalar_lea.sflag [#allocation10], %s298_s1 }
  0x37   : > { %s1517_s6 = scalar_lea.vmem [#allocation8], %s863_s29  ;;  %s1519_s14 = scalar_lea.vmem [#allocation9], %s862_s20 }
  0x38   : > { %1319 = dma.done.wait (%p1471_p11), %s317_s7, 2048  }
  0x39   : > { %1321 = vsyncadd (%p1471_p11), %s317_s7, 4294965248  ;;  %p865_p1 = scmp.ne.s32.totalorder %s1340_s21, 0 }
  0x3b   : > { %361 = sbr.rel (%p865_p1) target bundleno = 67 (0x43), region = 60 }
  0x40   : > { %v1356_v0 = vmov 0.0  }
  0x41   : > { %362 = vst [vmem:[#allocation2] sm:$0xff] %v1356_v0 }
  0x42   : > { %363 = vst [vmem:[#allocation2 + $0x8] sm:$0xff] %v1356_v0 }
  0x43 PF: > { %v928_v1 = vld [vmem:[%s1511_s24 + $0x70] sm:$0xf]  ;;  %v1021_v2 = vld [vmem:[%s1511_s24 + $0x74] sm:$0xf0]  ;;  %v1020_v3 = vld [vmem:[%s1511_s24 + $0x74] sm:$0xf] }
  0x44   : > { %v929_v4 = vor.u32 %v1021_v2, %v928_v1  ;;  %v930_v5 = vld [vmem:[%s1511_s24 + $0x78] sm:$0xf0]  ;;  %v920_v6 = vld [vmem:[%s1511_s24 + $0x60] sm:$0xf]  ;;  %v1019_v7 = vld [vmem:[%s1511_s24 + $0x64] sm:$0xf0] }
  0x45   : > { %v933_v8 = vor.u32 %v1020_v3, %v930_v5  ;;  %v1018_v9 = vld [vmem:[%s1511_s24 + $0x64] sm:$0xf]  ;;  %v922_v10 = vld [vmem:[%s1511_s24 + $0x68] sm:$0xf0]  ;;  %v921_v11 = vor.u32 %v1019_v7, %v920_v6  ;;  %v912_v13 = vld [vmem:[%s1511_s24 + $0x50] sm:$0xf] }
  0x46   : > { %474 = vmatpush.bf16.msra.mxu0 %v929_v4  ;;  %v925_v12 = vor.u32 %v1018_v9, %v922_v10  ;;  %v1017_v14 = vld [vmem:[%s1511_s24 + $0x54] sm:$0xf0]  ;;  %v1016_v15 = vld [vmem:[%s1511_s24 + $0x54] sm:$0xf]  ;;  %v914_v16 = vld [vmem:[%s1511_s24 + $0x58] sm:$0xf0] }
  0x47   : > { %488 = vmatpush.bf16.msra.mxu1 %v933_v8  ;;  %v913_v17 = vor.u32 %v1017_v14, %v912_v13  ;;  %v917_v18 = vor.u32 %v1016_v15, %v914_v16  ;;  %v904_v19 = vld [vmem:[%s1511_s24 + $0x40] sm:$0xf]  ;;  %v1015_v20 = vld [vmem:[%s1511_s24 + $0x44] sm:$0xf0]  ;;  %v1014_v21 = vld [vmem:[%s1511_s24 + $0x44] sm:$0xf] }
  0x48   : > { %v906_v22 = vld [vmem:[%s1511_s24 + $0x48] sm:$0xf0]  ;;  %v905_v23 = vor.u32 %v1015_v20, %v904_v19  ;;  %v896_v25 = vld [vmem:[%s1511_s24 + $0x30] sm:$0xf]  ;;  %v1013_v26 = vld [vmem:[%s1511_s24 + $0x34] sm:$0xf0] }
  0x49   : > { %v909_v24 = vor.u32 %v1014_v21, %v906_v22  ;;  %v1012_v27 = vld [vmem:[%s1511_s24 + $0x34] sm:$0xf]  ;;  %v898_v28 = vld [vmem:[%s1511_s24 + $0x38] sm:$0xf0]  ;;  %v897_v29 = vor.u32 %v1013_v26, %v896_v25  ;;  %v888_v31 = vld [vmem:[%s1511_s24 + $0x20] sm:$0xf] }
  0x4a   : > { %475 = vmatpush.bf16.msra.mxu0 %v921_v11  ;;  %v901_v30 = vor.u32 %v1012_v27, %v898_v28  ;;  %v1011_v32 = vld [vmem:[%s1511_s24 + $0x24] sm:$0xf0]  ;;  %v1010_v33 = vld [vmem:[%s1511_s24 + $0x24] sm:$0xf]  ;;  %v890_v34 = vld [vmem:[%s1511_s24 + $0x28] sm:$0xf0] }
  0x4b   : > { %489 = vmatpush.bf16.msra.mxu1 %v925_v12  ;;  %v889_v35 = vor.u32 %v1011_v32, %v888_v31  ;;  %v893_v36 = vor.u32 %v1010_v33, %v890_v34  ;;  %v880_v37 = vld [vmem:[%s1511_s24 + $0x10] sm:$0xf]  ;;  %v1009_v38 = vld [vmem:[%s1511_s24 + $0x14] sm:$0xf0]  ;;  %v1008_v39 = vld [vmem:[%s1511_s24 + $0x14] sm:$0xf] }
  0x4c   : > { %v882_v40 = vld [vmem:[%s1511_s24 + $0x18] sm:$0xf0]  ;;  %v881_v41 = vor.u32 %v1009_v38, %v880_v37  ;;  %v872_v43 = vld [vmem:[%s1511_s24] sm:$0xf]  ;;  %v1007_v44 = vld [vmem:[%s1511_s24 + $0x4] sm:$0xf0] }
  0x4d   : > { %v885_v42 = vor.u32 %v1008_v39, %v882_v40  ;;  %v1006_v45 = vld [vmem:[%s1511_s24 + $0x4] sm:$0xf]  ;;  %v874_v46 = vld [vmem:[%s1511_s24 + $0x8] sm:$0xf0]  ;;  %v873_v47 = vor.u32 %v1007_v44, %v872_v43  ;;  %v1005_v49 = vld [vmem:[#allocation3] sm:$0xff]  ;;  %p998_p2 = scmp.ne.s32.totalorder %s1340_s21, 1 }
  0x4e   : > { %476 = vmatpush.bf16.msra.mxu0 %v913_v17  ;;  %v877_v48 = vor.u32 %v1006_v45, %v874_v46  ;;  %v1029_v50 = vld [vmem:[%s1519_s14 + $0x38] sm:$0xff]  ;;  %v1028_v52 = vld [vmem:[%s1519_s14 + $0x30] sm:$0xff]  ;;  %v1027_v54 = vld [vmem:[%s1519_s14 + $0x28] sm:$0xff] }
  0x4f   : > { %490 = vmatpush.bf16.msra.mxu1 %v917_v18  ;;  %v1037_v51 = vld [vmem:[%s1519_s14 + $0x78] sm:$0xff]  ;;  %670 = vmatpush.bf16.msra.mxu2 %v1029_v50  ;;  %v1036_v53 = vld [vmem:[%s1519_s14 + $0x70] sm:$0xff]  ;;  %v1035_v55 = vld [vmem:[%s1519_s14 + $0x68] sm:$0xff] }
  0x50   : > { %684 = vmatpush.bf16.msra.mxu3 %v1037_v51  ;;  %v1026_v56 = vld [vmem:[%s1519_s14 + $0x20] sm:$0xff]  ;;  %v1025_v58 = vld [vmem:[%s1519_s14 + $0x18] sm:$0xff]  ;;  %v1024_v60 = vld [vmem:[%s1519_s14 + $0x10] sm:$0xff] }
  0x51   : > { %v1034_v57 = vld [vmem:[%s1519_s14 + $0x60] sm:$0xff]  ;;  %v1033_v59 = vld [vmem:[%s1519_s14 + $0x58] sm:$0xff]  ;;  %v1032_v61 = vld [vmem:[%s1519_s14 + $0x50] sm:$0xff] }
  0x52   : > { %477 = vmatpush.bf16.msra.mxu0 %v905_v23  ;;  %v1023_v62 = vld [vmem:[%s1519_s14 + $0x8] sm:$0xff]  ;;  %v382_v0 = vld [vmem:[%s1517_s6] sm:$0x3]  ;;  %v1022_v1 = vld [vmem:[%s1519_s14] sm:$0xff] }
  0x53   : > { %491 = vmatpush.bf16.msra.mxu1 %v909_v24  ;;  %671 = vmatpush.bf16.msra.mxu2 %v1028_v52  ;;  %v1031_v63 = vld [vmem:[%s1519_s14 + $0x48] sm:$0xff]  ;;  %v1030_v2 = vld [vmem:[%s1519_s14 + $0x40] sm:$0xff]  ;;  %v384_v3 = vperm.slane %v382_v0, 0  ;;  %v385_v4 = vperm.slane %v382_v0, 1 }
  0x54   : > { %685 = vmatpush.bf16.msra.mxu3 %v1036_v53  ;;  %v538_v52 = vld [vmem:[#allocation2] sm:$0xff] }
  0x56   : > { %478 = vmatpush.bf16.msra.mxu0 %v897_v29 }
  0x57   : > { %492 = vmatpush.bf16.msra.mxu1 %v901_v30  ;;  %672 = vmatpush.bf16.msra.mxu2 %v1027_v54 }
  0x58   : > { %686 = vmatpush.bf16.msra.mxu3 %v1035_v55 }
  0x5a   : > { %479 = vmatpush.bf16.msra.mxu0 %v889_v35 }
  0x5b   : > { %493 = vmatpush.bf16.msra.mxu1 %v893_v36  ;;  %673 = vmatpush.bf16.msra.mxu2 %v1026_v56 }
  0x5c   : > { %687 = vmatpush.bf16.msra.mxu3 %v1034_v57  ;;  %v539_v57 = vld [vmem:[#allocation2 + $0x8] sm:$0xff] }
  0x5e   : > { %480 = vmatpush.bf16.msra.mxu0 %v881_v41 }
  0x5f   : > { %494 = vmatpush.bf16.msra.mxu1 %v885_v42  ;;  %674 = vmatpush.bf16.msra.mxu2 %v1025_v58 }
  0x60   : > { %688 = vmatpush.bf16.msra.mxu3 %v1033_v59 }
  0x62   : > { %481 = vmatpush.bf16.msra.mxu0 %v873_v47 }
  0x63   : > { %495 = vmatpush.bf16.msra.mxu1 %v877_v48  ;;  %675 = vmatpush.bf16.msra.mxu2 %v1024_v60 }
  0x64   : > { %689 = vmatpush.bf16.msra.mxu3 %v1032_v61 }
  0x65   : > { %482 = vmatmul.bf16.vlgmr.msra.gmra.mxu0 %v1005_v49 }
  0x66   : > { %496 = vmatmul.bf16.vlgmr.msra.gmra.mxu1 %v1005_v49 }
  0x67   : > { %676 = vmatpush.bf16.msra.mxu2 %v1023_v62 }
  0x68   : > { %690 = vmatpush.bf16.msra.mxu3 %v1031_v63 }
  0x6b   : > { %677 = vmatpush.bf16.msra.mxu2 %v1022_v1 }
  0x6c   : > { %691 = vmatpush.bf16.msra.mxu3 %v1030_v2 }
  0xe2   : > { %v483_v5 = vpop.f32.mrf.mxu0 }
  0xe3   : > { %v484_v6 = vadd.f32 %v483_v5, %v384_v3  ;;  %v497_v7 = vpop.f32.mrf.mxu1 }
  0xe4   : > { %v498_v8 = vadd.f32 %v497_v7, %v385_v4 }
  0xe5   : > { %v506_v9 = vmul.f32 %v484_v6, %v484_v6  ;;  %v502_v16 = vmul.f32 0.7978846, %v484_v6  ;;  %v522_v39 = vmul.f32 0.5, %v484_v6 }
  0xe6   : > { %v507_v10 = vmul.f32 %v498_v8, %v498_v8  ;;  %v503_v19 = vmul.f32 0.7978846, %v498_v8  ;;  %v523_v42 = vmul.f32 0.5, %v498_v8 }
  0xe7   : > { %v510_v11 = vmul.f32 0.044715, %v506_v9 }
  0xe8   : > { %v511_v12 = vmul.f32 0.044715, %v507_v10 }
  0xe9   : > { %v514_v13 = vadd.f32 1.0, %v510_v11 }
  0xea   : > { %v515_v14 = vadd.f32 1.0, %v511_v12  ;;  %v485_v15 = vpop.f32.mrf.mxu0 }
  0xeb   : > { %v486_v17 = vadd.f32 %v485_v15, %v384_v3  ;;  %v499_v18 = vpop.f32.mrf.mxu1  ;;  %v518_v21 = vmul.f32 %v514_v13, %v502_v16 }
  0xec   : > { %v500_v20 = vadd.f32 %v499_v18, %v385_v4  ;;  %v519_v23 = vmul.f32 %v515_v14, %v503_v19 }
  0xed   : > { %v508_v22 = vmul.f32 %v486_v17, %v486_v17  ;;  %v504_v27 = vmul.f32 0.7978846, %v486_v17  ;;  %1129 = vtanh.f32 %v518_v21  ;;  %v524_v40 = vmul.f32 0.5, %v486_v17 }
  0xee   : > { %v509_v24 = vmul.f32 %v500_v20, %v500_v20  ;;  %v505_v29 = vmul.f32 0.7978846, %v500_v20  ;;  %1131 = vtanh.f32 %v519_v23  ;;  %v525_v43 = vmul.f32 0.5, %v500_v20 }
  0xef   : > { %v512_v25 = vmul.f32 0.044715, %v508_v22 }
  0xf0   : > { %v513_v26 = vmul.f32 0.044715, %v509_v24 }
  0xf1   : > { %v516_v28 = vadd.f32 1.0, %v512_v25 }
  0xf2   : > { %v517_v30 = vadd.f32 1.0, %v513_v26 }
  0xf3   : > { %v520_v31 = vmul.f32 %v516_v28, %v504_v27  ;;  %v1130_v33 = vpop.eup %1129 }
  0xf4   : > { %v521_v32 = vmul.f32 %v517_v30, %v505_v29  ;;  %v1132_v34 = vpop.eup %1131  ;;  %v530_v35 = vadd.f32 1.0, %v1130_v33 }
  0xf5   : > { %1133 = vtanh.f32 %v520_v31  ;;  %v531_v37 = vadd.f32 1.0, %v1132_v34 }
  0xf6   : > { %1135 = vtanh.f32 %v521_v32  ;;  %v534_v45 = vmul.f32 %v530_v35, %v522_v39 }
  0xf7   : > { %v535_v47 = vmul.f32 %v531_v37, %v523_v42 }
  0xfb   : > { %v1134_v36 = vpop.eup %1133 }
  0xfc   : > { %v1136_v38 = vpop.eup %1135  ;;  %v532_v41 = vadd.f32 1.0, %v1134_v36 }
  0xfd   : > { %v533_v44 = vadd.f32 1.0, %v1136_v38 }
  0xfe   : > { %v536_v46 = vmul.f32 %v532_v41, %v524_v40 }
  0xff   : > { %v537_v48 = vmul.f32 %v533_v44, %v525_v43 }
 0x100   : > { %v540_v49 = vpack.c.bf16 %v536_v46, %v534_v45 }
 0x101   : > { %v541_v50 = vpack.c.bf16 %v537_v48, %v535_v47 }
 0x102   : > { %678 = vmatmul.bf16.vlgmr.msra.gmra.mxu2 %v540_v49 }
 0x103   : > { %692 = vmatmul.bf16.vlgmr.msra.gmra.mxu3 %v541_v50 }
 0x185   : > { %v679_v51 = vpop.f32.mrf.mxu2 }
 0x186   : > { %v693_v53 = vpop.f32.mrf.mxu3 }
 0x187   : > { %v694_v54 = vadd.f32 %v693_v53, %v679_v51 }
 0x189   : > { %v698_v55 = vadd.f32 %v694_v54, %v538_v52 }
 0x18b   : > { %700 = vst [vmem:[#allocation2] sm:$0xff] %v698_v55 }
 0x18d   : > { %v681_v56 = vpop.f32.mrf.mxu2 }
 0x18e   : > { %v695_v58 = vpop.f32.mrf.mxu3 }
 0x18f   : > { %v696_v59 = vadd.f32 %v695_v58, %v681_v56  ;;  %705 = sbr.rel (%p998_p2) target bundleno = 414 (0x19e), region = 64 }
 0x191   : > { %v699_v60 = vadd.f32 %v696_v59, %v539_v57 }
 0x193   : > { %701 = vst [vmem:[#allocation2 + $0x8] sm:$0xff] %v699_v60 }
 0x194   : > { %v706_v61 = vld [vmem:[#allocation2] sm:$0xff] }
 0x195   : > { %v1137_v62 = vld [vmem:[%s1605_s4] ss:$0 sm:$0xff] }
 0x196   : > { %v712_v0 = vadd.f32 %v1137_v62, %v706_v61 }
 0x198   : > { %714 = vst [vmem:[#allocation11] sm:$0xff] %v712_v0 }
 0x19a   : > { %v707_v63 = vld [vmem:[#allocation2 + $0x8] sm:$0xff] }
 0x19b   : > { %v713_v1 = vadd.f32 %v1137_v62, %v707_v63 }
 0x19d   : > { %715 = vst [vmem:[#allocation11 + $0x8] sm:$0xff] %v713_v1 }
 0x19e PF: > { %p1069_p3 = scmp.eq.s32.totalorder %s1462_s27, 1  ;;  %s726_s10 = sshll.u32 %s1606_s5, 4  ;;  %s727_s10 = int_to_ptr.hbm [resolvable:$true] %s726_s10 }
 0x19f   : > { %s1357_s11 = smov [#allocation11]   ;;  %s1358_s17 = smov 128  }
 0x1a0   : > { %s724_s21 = sshll.u32 %s1357_s11, 4  ;;  %s1359_s25 = smov 8   ;;  %s725_s21 = int_to_ptr.vmem [resolvable:$true] %s724_s21 }
 0x1a1   : > { %1049 = dma.vmem_to_hbm [thread:$0]  (%p1069_p3), %s725_s21, 256, %s727_s10, [#allocation5], %s1358_s17, %s1358_s17, %s1359_s25  }
 0x1a2   : > { %1323 = dma.done.wait (%p1069_p3), [#allocation5], 256  }
 0x1a3   : > { %1325 = vsyncadd (%p1069_p3), [#allocation5], 4294967040 }
 0x1a4 PF: > { %s1624_s28 = sld [smem:[#allocation17_spill]]  ;;  %s1628_s18 = smov %s1332_s19 }
 0x1a5   : > { %s1625_s30 = sld [smem:[#allocation16_spill]]  ;;  %s1630_s21 = smov %s1344_s22 }
 0x1a6   : > { %s1626_s20 = sld [smem:[#allocation19_spill]] }
 0x1a7   : > { %s1627_s27 = sld [smem:[#allocation18_spill]] }
 0x1aa   : > { %s23_s23 = sadd.s32 1, %s1624_s28  }
 0x1ab   : > { %p20_p4 = scmp.ge.s32.totalorder %s23_s23, 4   ;;  %s1629_s19 = smov %s1625_s30 }
 0x1ad   : > { %s1631_s22 = smov %s1627_s27  ;;  %22 = sbr.rel (!%p20_p4) target bundleno = 11 (0xb), region = 116 }
 0x1b2   :  { %743 = vsyncpa [#allocation4], 1 }
 0x1b3   :  { %745 = vsyncpa [#allocation4 + $0x1], 1 }
 0x1b4   :  { %746 = vsyncpa [#allocation7], 1 }
 0x1b5   :  { %748 = vsyncpa [#allocation7 + $0x1], 1 }
 0x1b6   :  { %749 = vsyncpa [#allocation10], 1 }
 0x1b7   :  { %751 = vsyncpa [#allocation10 + $0x1], 1 }
 0x1b8   :  { %752 = vsyncpa [#allocation5], 1 }
 0x1b9   :  { %754 = vsyncpa [#allocation5 + $0x1], 1 }

</bundles_post_ra>
